<compile_context>
chip_gen: v5e
topology: v5e:2x2
jax: 0.10.0
libtpu: 0.0.40
codegen_flags: <defaults>
</compile_context>

<pallas_src>
import functools

import jax
import jax.numpy as jnp
import numpy as np
from jax import lax
from jax.experimental import pallas as pl
from jax.experimental.pallas import tpu as pltpu


def _round_up(x, m):
    return (x + m - 1) // m * m


def encoder_gru_chunk_kernel(
    n_layers, Tc, Hp, T, T_pad,   # static (bound via functools.partial)
    gi_ref,      # VMEM (Tc, 3Hp) f32  pre-gated layer-0 input projections (chunk)
    h0_ref,      # VMEM (1, Hp)   f32  initial hidden state (resident)
    w_h_ref,     # VMEM (Hp, 3Hp) wdt  W_hh^T, gate blocks [r|z|n] (resident)
    w_i_ref,     # VMEM (Hp, 3Hp) wdt  W_ih^T (only used when n_layers > 1)
    b_ref,       # VMEM (2, 3Hp)  f32  row0 = b_ih (layers>=2), row1 = b_hh
    out_ref,     # VMEM (Tc, Hp)  f32  per-step GRU outputs for this chunk
    h_fin_ref,   # VMEM (1, Hp)   f32  final hidden state (resident)
    h_scr,       # VMEM (1, Hp)   f32  hidden carried across grid steps
):
    f32 = jnp.float32
    c = pl.program_id(0)

    @pl.when(c == 0)
    def _():
        h_scr[...] = h0_ref[...]

    w_h = w_h_ref[...]
    cdt = w_h.dtype                     # matmul-operand dtype (f32 or bf16)
    b_h = b_ref[1:2, :]                 # (1, 3Hp)
    b_i = b_ref[0:1, :] if n_layers > 1 else None

    def cell(gi, h):
        # h-side projection; activations cast to the weight dtype so a bf16
        # weight path actually hits the bf16 MXU.  Gate math stays f32.
        gh = jnp.dot(h.astype(cdt), w_h, preferred_element_type=f32) + b_h
        r = jax.nn.sigmoid(gi[:, 0:Hp] + gh[:, 0:Hp])
        z = jax.nn.sigmoid(gi[:, Hp:2 * Hp] + gh[:, Hp:2 * Hp])
        n = jnp.tanh(gi[:, 2 * Hp:3 * Hp] + r * gh[:, 2 * Hp:3 * Hp])
        return (1.0 - z) * n + z * h

    def step(i, h):
        gi0 = gi_ref[pl.ds(i, 1), :]                      # (1, 3Hp)
        h_new = cell(gi0, h)
        # n_layers is tiny & static (default 1); mirrors the PyTorch forward
        # loop that re-applies the same single-layer GRU to its own output.
        for _ in range(n_layers - 1):
            gi = jnp.dot(h_new.astype(cdt), w_i_ref[...],
                         preferred_element_type=f32) + b_i
            h_new = cell(gi, h_new)
        if T_pad != T:                                    # mask padded tail steps
            g = c * Tc + i
            h_new = jnp.where(g < T, h_new, h)
        out_ref[pl.ds(i, 1), :] = h_new                   # VMEM store; one HBM flush/chunk
        return h_new

    h_last = lax.fori_loop(0, Tc, step, h_scr[...])
    h_scr[...] = h_last                                   # carry to next chunk

    @pl.when(c == pl.num_programs(0) - 1)
    def _():
        h_fin_ref[...] = h_last                           # single final-hidden store


def prepare_encoder_params(params, param_dtype=jnp.float32):
    """One-time weight layout prep (do NOT call per decode step).

    Builds the pre-gated (V, 3*Hp) input-projection table (embedding @ W_ih^T +
    b_ih folded together) and lane-aligned, gate-padded h-side weights/biases.
    """
    f32 = jnp.float32
    H = params["gru_w_ih"].shape[1]
    Hp = max(128, _round_up(H, 128))

    def pad_gate_cols(mat):
        # (..., 3H) -> (..., 3Hp): each gate block starts at a multiple of Hp.
        r, z, n = jnp.split(jnp.asarray(mat, dtype=f32), 3, axis=-1)

        def padg(g):
            widths = [(0, 0)] * (g.ndim - 1) + [(0, Hp - H)]
            return jnp.pad(g, widths)

        return jnp.concatenate([padg(r), padg(z), padg(n)], axis=-1)

    def pad_rows(mat):   # (H, 3Hp) -> (Hp, 3Hp), zero rows for padded lanes
        return jnp.pad(mat, ((0, Hp - H), (0, 0)))

    emb = params["embedding"].astype(f32)            # (V, H)
    w_ih_t = params["gru_w_ih"].astype(f32).T        # (H, 3H)
    w_hh_t = params["gru_w_hh"].astype(f32).T        # (H, 3H)
    b_ih = params["gru_b_ih"].astype(f32)            # (3H,)
    b_hh = params["gru_b_hh"].astype(f32)            # (3H,)

    # Layer-0 pre-gated table: gi_t = emb[tok_t] @ W_ih^T + b_ih, gate-padded.
    gi_table = pad_gate_cols(emb @ w_ih_t + b_ih[None, :])          # (V, 3Hp) f32

    return {
        "H": H,
        "Hp": Hp,
        "gi_table": gi_table,
        "w_h": pad_rows(pad_gate_cols(w_hh_t)).astype(param_dtype),  # (Hp, 3Hp)
        "w_i": pad_rows(pad_gate_cols(w_ih_t)).astype(param_dtype),  # (Hp, 3Hp)
        "b": jnp.stack([pad_gate_cols(b_ih), pad_gate_cols(b_hh)], axis=0),  # (2, 3Hp)
    }


def encoder_rnn_encode(tokens, hidden, prep, n_layers=1, chunk=64):
    """Run the EncoderRNN over a whole token sequence in one pallas_call.

    tokens: (T,) int32; hidden: (1, 1, H) initial hidden state.
    Returns (outputs (T, 1, H), final hidden (1, 1, H)).
    """
    f32 = jnp.float32
    H, Hp = prep["H"], prep["Hp"]
    T = int(tokens.shape[0])
    Tc = _round_up(min(chunk, _round_up(T, 8)), 8)
    T_pad = _round_up(T, Tc)
    n_chunks = T_pad // Tc

    # Hoisted layer-0 projections: one gather for the whole sequence.
    gi_seq = jnp.take(prep["gi_table"], tokens.astype(jnp.int32), axis=0)  # (T, 3Hp)
    if T_pad != T:
        gi_seq = jnp.pad(gi_seq, ((0, T_pad - T), (0, 0)))

    h0 = jnp.pad(hidden.reshape(1, H).astype(f32), ((0, 0), (0, Hp - H)))

    kernel = functools.partial(encoder_gru_chunk_kernel, n_layers, Tc, Hp, T, T_pad)

    grid_spec = pltpu.PrefetchScalarGridSpec(
        num_scalar_prefetch=0,
        grid=(n_chunks,),
        in_specs=[
            pl.BlockSpec((Tc, 3 * Hp), lambda c: (c, 0)),     # pre-gated gi chunk
            pl.BlockSpec((1, Hp), lambda c: (0, 0)),          # h0 (resident)
            pl.BlockSpec((Hp, 3 * Hp), lambda c: (0, 0)),     # W_hh^T (resident)
            pl.BlockSpec((Hp, 3 * Hp), lambda c: (0, 0)),     # W_ih^T (resident)
            pl.BlockSpec((2, 3 * Hp), lambda c: (0, 0)),      # packed biases (resident)
        ],
        out_specs=[
            pl.BlockSpec((Tc, Hp), lambda c: (c, 0)),         # lane-dense per-step outputs
            pl.BlockSpec((1, Hp), lambda c: (0, 0)),          # final hidden (resident)
        ],
        scratch_shapes=[pltpu.VMEM((1, Hp), f32)],
    )

    # Raise scoped VMEM only when the real residency needs it (large H).
    wbytes = jnp.dtype(prep["w_h"].dtype).itemsize
    resident = 2 * Hp * 3 * Hp * wbytes + (2 + 2) * 3 * Hp * 4 + 2 * Hp * 4
    streamed = 2 * (Tc * 3 * Hp * 4 + Tc * Hp * 4)            # double-buffered in/out
    needed = 2 * resident + streamed + (2 << 20)
    vmem_limit = int(needed) if needed > (16 << 20) else None

    outputs, h_fin = pl.pallas_call(
        kernel,
        grid_spec=grid_spec,
        out_shape=(
            jax.ShapeDtypeStruct((T_pad, Hp), f32),
            jax.ShapeDtypeStruct((1, Hp), f32),
        ),
        compiler_params=pltpu.CompilerParams(
            dimension_semantics=("arbitrary",),               # hidden-state carry
            vmem_limit_bytes=vmem_limit,
        ),
    )(gi_seq, h0, prep["w_h"], prep["w_i"], prep["b"])

    outs = outputs[:T, :H].reshape(T, 1, H)
    return outs, h_fin[:, :H].reshape(1, 1, H)


def encoder_rnn_forward(token, hidden, prep, n_layers=1):
    """Single-step forward matching the PyTorch module signature.

    NOTE: for token-by-token decoding prefer encoder_rnn_encode over calling
    this in a Python loop — each call re-DMAs the resident weight slabs.
    """
    outputs, h_fin = encoder_rnn_encode(token.reshape(1), hidden, prep, n_layers)
    H = prep["H"]
    return outputs.reshape(1, 1, H), h_fin


def encoder_rnn_reference(tokens, hidden, params, n_layers=1):
    """Pure-JAX reference mirroring the PyTorch forward."""
    H = params["gru_w_ih"].shape[1]
    h = hidden.reshape(1, H)
    outs = []
    for t in range(tokens.shape[0]):
        x = params["embedding"][tokens[t]].reshape(1, H)
        for _ in range(n_layers):
            gi = x @ params["gru_w_ih"].T + params["gru_b_ih"]
            gh = h @ params["gru_w_hh"].T + params["gru_b_hh"]
            r = jax.nn.sigmoid(gi[:, :H] + gh[:, :H])
            z = jax.nn.sigmoid(gi[:, H:2 * H] + gh[:, H:2 * H])
            n = jnp.tanh(gi[:, 2 * H:] + r * gh[:, 2 * H:])
            h = (1.0 - z) * n + z * h
            x = h
        outs.append(x)
    return jnp.stack(outs, axis=0), h.reshape(1, 1, H)


if __name__ == "__main__":
    HIDDEN, VOCAB, SEQ = 32, 64, 8   # hidden_size, input_size (vocab), sequence length

    key = jax.random.PRNGKey(0)
    ks = jax.random.split(key, 8)

    def init(k, shape, scale=0.1):
        return scale * jax.random.normal(k, shape, dtype=jnp.float32)

    params = {
        "embedding": init(ks[0], (VOCAB, HIDDEN)),
        "gru_w_ih": init(ks[1], (3 * HIDDEN, HIDDEN)),
        "gru_w_hh": init(ks[2], (3 * HIDDEN, HIDDEN)),
        "gru_b_ih": init(ks[3], (3 * HIDDEN,)),
        "gru_b_hh": init(ks[4], (3 * HIDDEN,)),
    }

    tokens = jax.random.randint(ks[5], (SEQ,), 0, VOCAB, dtype=jnp.int32)
    hidden0 = init(ks[6], (1, 1, HIDDEN))                     # a previous hidden state
    zero_hidden = jnp.zeros((1, 1, HIDDEN), jnp.float32)      # module's initHidden()

    prep = prepare_encoder_params(params)                     # one-time weight prep

    # --- multi-step: whole sequence in one pallas_call (weights VMEM-resident) ---
    outs, h_fin = encoder_rnn_encode(tokens, zero_hidden, prep)
    jax.block_until_ready((outs, h_fin))
    ref_outs, ref_h = encoder_rnn_reference(tokens, zero_hidden, params)
    np.testing.assert_allclose(np.asarray(outs), np.asarray(ref_outs), rtol=1e-4, atol=1e-5)
    np.testing.assert_allclose(np.asarray(h_fin), np.asarray(ref_h), rtol=1e-4, atol=1e-5)

    # --- single-step forward exactly matching the PyTorch module's forward() ---
    token = tokens[:1]
    out1, h1 = encoder_rnn_forward(token, hidden0, prep)
    jax.block_until_ready((out1, h1))
    ref_out1, ref_h1 = encoder_rnn_reference(token, hidden0, params)
    np.testing.assert_allclose(np.asarray(out1), np.asarray(ref_out1), rtol=1e-4, atol=1e-5)
    np.testing.assert_allclose(np.asarray(h1), np.asarray(ref_h1), rtol=1e-4, atol=1e-5)

    # --- n_layers=2 path (exercises the in-kernel W_ih branch) ---
    outs2, h2 = encoder_rnn_encode(tokens, zero_hidden, prep, n_layers=2)
    jax.block_until_ready((outs2, h2))
    ref_outs2, ref_h2 = encoder_rnn_reference(tokens, zero_hidden, params, n_layers=2)
    np.testing.assert_allclose(np.asarray(outs2), np.asarray(ref_outs2), rtol=1e-4, atol=1e-5)
    np.testing.assert_allclose(np.asarray(h2), np.asarray(ref_h2), rtol=1e-4, atol=1e-5)

    assert outs.shape == (SEQ, 1, HIDDEN) and h_fin.shape == (1, 1, HIDDEN)
    assert out1.shape == (1, 1, HIDDEN) and h1.shape == (1, 1, HIDDEN)
    print("KERNEL_OK")
</pallas_src>

<mosaic_0001>
module attributes {stable_mosaic.version = 11 : i64} {
  func.func @encoder_gru_chunk_kernel(%arg0: i32, %arg1: memref<8x384xf32, #tpu.memory_space<vmem>>, %arg2: memref<1x128xf32, #tpu.memory_space<vmem>>, %arg3: memref<128x384xf32, #tpu.memory_space<vmem>>, %arg4: memref<128x384xf32, #tpu.memory_space<vmem>>, %arg5: memref<2x384xf32, #tpu.memory_space<vmem>>, %arg6: memref<8x128xf32, #tpu.memory_space<vmem>>, %arg7: memref<1x128xf32, #tpu.memory_space<vmem>>, %arg8: memref<1x128xf32, #tpu.memory_space<vmem>>) attributes {dimension_semantics = [#tpu.dimension_semantics<arbitrary>], iteration_bounds = array<i64: 1>, scalar_prefetch = 0 : i64, scratch_operands = 1 : i64, tpu.core_type = #tpu.core_type<tc>, window_params = [{transform_indices = @transform_0, window_bounds = array<i64: 8, 384>}, {pipeline_mode = #tpu.pipeline_mode<synchronous>, transform_indices = @transform_1, window_bounds = array<i64: 1, 128>}, {pipeline_mode = #tpu.pipeline_mode<synchronous>, transform_indices = @transform_2, window_bounds = array<i64: 128, 384>}, {pipeline_mode = #tpu.pipeline_mode<synchronous>, transform_indices = @transform_3, window_bounds = array<i64: 128, 384>}, {pipeline_mode = #tpu.pipeline_mode<synchronous>, transform_indices = @transform_4, window_bounds = array<i64: 2, 384>}, {transform_indices = @transform_5, window_bounds = array<i64: 8, 128>}, {pipeline_mode = #tpu.pipeline_mode<synchronous>, transform_indices = @transform_6, window_bounds = array<i64: 1, 128>}]} {
    %c0_i32 = arith.constant 0 : i32
    %0 = arith.cmpi eq, %arg0, %c0_i32 : i32
    %1 = arith.extui %0 : i1 to i32
    %c0_i32_0 = arith.constant 0 : i32
    %2 = arith.cmpi ne, %1, %c0_i32_0 : i32
    scf.if %2 {
      %c0_11 = arith.constant 0 : index
      %c0_12 = arith.constant 0 : index
      %12 = vector.load %arg2[%c0_11, %c0_12] : memref<1x128xf32, #tpu.memory_space<vmem>>, vector<1x128xf32>
      %c0_13 = arith.constant 0 : index
      %c0_14 = arith.constant 0 : index
      %13 = vector.load %arg8[%c0_13, %c0_14] : memref<1x128xf32, #tpu.memory_space<vmem>>, vector<1x128xf32>
      tpu.vector_store %arg8[%c0_13, %c0_14], %12 {strides = array<i32>} : memref<1x128xf32, #tpu.memory_space<vmem>>, vector<1x128xf32>,
    } else {
    }
    %c0 = arith.constant 0 : index
    %c0_1 = arith.constant 0 : index
    %3 = vector.load %arg3[%c0, %c0_1] : memref<128x384xf32, #tpu.memory_space<vmem>>, vector<128x384xf32>
    %c1 = arith.constant 1 : index
    %c0_2 = arith.constant 0 : index
    %4 = vector.load %arg5[%c1, %c0_2] : memref<2x384xf32, #tpu.memory_space<vmem>>, vector<1x384xf32>
    %c0_3 = arith.constant 0 : index
    %c0_4 = arith.constant 0 : index
    %5 = vector.load %arg8[%c0_3, %c0_4] : memref<1x128xf32, #tpu.memory_space<vmem>>, vector<1x128xf32>
    %c0_i32_5 = arith.constant 0 : i32
    %c8_i32 = arith.constant 8 : i32
    %6 = arith.addi %c0_i32_5, %c8_i32 : i32
    %c1_i32 = arith.constant 1 : i32
    %7 = scf.for %arg9 = %c0_i32_5 to %6 step %c1_i32 iter_args(%arg10 = %5) -> (vector<1x128xf32>)  : i32 {
      %12 = arith.index_cast %arg9 : i32 to index
      %c0_11 = arith.constant 0 : index
      %13 = vector.load %arg1[%12, %c0_11] : memref<8x384xf32, #tpu.memory_space<vmem>>, vector<1x384xf32>
      %cst = arith.constant dense<0.000000e+00> : vector<1x384xf32>
      %14 = tpu.matmul %arg10, %3, %cst {dimension_numbers = #tpu.dot_dimension_numbers<[1], [0], [0], [1], [0, 0, 1, 1], [], []>} : vector<1x128xf32>, vector<128x384xf32>, vector<1x384xf32> -> vector<1x384xf32>
      %15 = arith.addf %14, %4 : vector<1x384xf32>
      %16 = vector.extract_strided_slice %13 {offsets = [0, 0], sizes = [1, 128], strides = [1, 1]} : vector<1x384xf32> to vector<1x128xf32>
      %17 = vector.extract_strided_slice %15 {offsets = [0, 0], sizes = [1, 128], strides = [1, 1]} : vector<1x384xf32> to vector<1x128xf32>
      %18 = arith.addf %16, %17 : vector<1x128xf32>
      %19 = arith.negf %18 : vector<1x128xf32>
      %20 = math.exp %19 : vector<1x128xf32>
      %cst_12 = arith.constant 1.000000e+00 : f32
      %21 = vector.broadcast %cst_12 : f32 to vector<1x128xf32>
      %22 = arith.addf %21, %20 : vector<1x128xf32>
      %23 = arith.divf %21, %22 : vector<1x128xf32>
      %24 = vector.extract_strided_slice %13 {offsets = [0, 128], sizes = [1, 128], strides = [1, 1]} : vector<1x384xf32> to vector<1x128xf32>
      %25 = vector.extract_strided_slice %15 {offsets = [0, 128], sizes = [1, 128], strides = [1, 1]} : vector<1x384xf32> to vector<1x128xf32>
      %26 = arith.addf %24, %25 : vector<1x128xf32>
      %27 = arith.negf %26 : vector<1x128xf32>
      %28 = math.exp %27 : vector<1x128xf32>
      %cst_13 = arith.constant 1.000000e+00 : f32
      %29 = vector.broadcast %cst_13 : f32 to vector<1x128xf32>
      %30 = arith.addf %29, %28 : vector<1x128xf32>
      %31 = arith.divf %29, %30 : vector<1x128xf32>
      %32 = vector.extract_strided_slice %13 {offsets = [0, 256], sizes = [1, 128], strides = [1, 1]} : vector<1x384xf32> to vector<1x128xf32>
      %33 = vector.extract_strided_slice %15 {offsets = [0, 256], sizes = [1, 128], strides = [1, 1]} : vector<1x384xf32> to vector<1x128xf32>
      %34 = arith.mulf %23, %33 : vector<1x128xf32>
      %35 = arith.addf %32, %34 : vector<1x128xf32>
      %36 = math.tanh %35 : vector<1x128xf32>
      %cst_14 = arith.constant 1.000000e+00 : f32
      %37 = vector.broadcast %cst_14 : f32 to vector<1x128xf32>
      %38 = arith.subf %37, %31 : vector<1x128xf32>
      %39 = arith.mulf %38, %36 : vector<1x128xf32>
      %40 = arith.mulf %31, %arg10 : vector<1x128xf32>
      %41 = arith.addf %39, %40 : vector<1x128xf32>
      %42 = arith.index_cast %arg9 : i32 to index
      %c0_15 = arith.constant 0 : index
      %43 = vector.load %arg6[%42, %c0_15] : memref<8x128xf32, #tpu.memory_space<vmem>>, vector<1x128xf32>
      tpu.vector_store %arg6[%42, %c0_15], %41 {strides = array<i32>} : memref<8x128xf32, #tpu.memory_space<vmem>>, vector<1x128xf32>,
      scf.yield %41 : vector<1x128xf32>
    }
    %c8_i32_6 = arith.constant 8 : i32
    %c0_7 = arith.constant 0 : index
    %c0_8 = arith.constant 0 : index
    %8 = vector.load %arg8[%c0_7, %c0_8] : memref<1x128xf32, #tpu.memory_space<vmem>>, vector<1x128xf32>
    tpu.vector_store %arg8[%c0_7, %c0_8], %7 {strides = array<i32>} : memref<1x128xf32, #tpu.memory_space<vmem>>, vector<1x128xf32>,
    %c0_i32_9 = arith.constant 0 : i32
    %9 = arith.cmpi eq, %arg0, %c0_i32_9 : i32
    %10 = arith.extui %9 : i1 to i32
    %c0_i32_10 = arith.constant 0 : i32
    %11 = arith.cmpi ne, %10, %c0_i32_10 : i32
    scf.if %11 {
      %c0_11 = arith.constant 0 : index
      %c0_12 = arith.constant 0 : index
      %12 = vector.load %arg7[%c0_11, %c0_12] : memref<1x128xf32, #tpu.memory_space<vmem>>, vector<1x128xf32>
      tpu.vector_store %arg7[%c0_11, %c0_12], %7 {strides = array<i32>} : memref<1x128xf32, #tpu.memory_space<vmem>>, vector<1x128xf32>,
    } else {
    }
    return
  }
  func.func @transform_0(%arg0: i32) -> (i32, i32) {
    %c0_i32 = arith.constant 0 : i32
    %c0_i32_0 = arith.constant 0 : i32
    return %arg0, %c0_i32 : i32, i32
  }
  func.func @transform_1(%arg0: i32) -> (i32, i32) {
    %c0_i32 = arith.constant 0 : i32
    %c0_i32_0 = arith.constant 0 : i32
    %c0_i32_1 = arith.constant 0 : i32
    return %c0_i32, %c0_i32_0 : i32, i32
  }
  func.func @transform_2(%arg0: i32) -> (i32, i32) {
    %c0_i32 = arith.constant 0 : i32
    %c0_i32_0 = arith.constant 0 : i32
    %c0_i32_1 = arith.constant 0 : i32
    return %c0_i32, %c0_i32_0 : i32, i32
  }
  func.func @transform_3(%arg0: i32) -> (i32, i32) {
    %c0_i32 = arith.constant 0 : i32
    %c0_i32_0 = arith.constant 0 : i32
    %c0_i32_1 = arith.constant 0 : i32
    return %c0_i32, %c0_i32_0 : i32, i32
  }
  func.func @transform_4(%arg0: i32) -> (i32, i32) {
    %c0_i32 = arith.constant 0 : i32
    %c0_i32_0 = arith.constant 0 : i32
    %c0_i32_1 = arith.constant 0 : i32
    return %c0_i32, %c0_i32_0 : i32, i32
  }
  func.func @transform_5(%arg0: i32) -> (i32, i32) {
    %c0_i32 = arith.constant 0 : i32
    %c0_i32_0 = arith.constant 0 : i32
    return %arg0, %c0_i32 : i32, i32
  }
  func.func @transform_6(%arg0: i32) -> (i32, i32) {
    %c0_i32 = arith.constant 0 : i32
    %c0_i32_0 = arith.constant 0 : i32
    %c0_i32_1 = arith.constant 0 : i32
    return %c0_i32, %c0_i32_0 : i32, i32
  }
}

</mosaic_0001>

<bundles_post_ra>
// kernel: tpu_custom_call.1
= control target key start
LH: loop header
LB: loop body
LE: loop exit
PB: predicated region body
PF: predicated region fallthrough
CT: control target
= control target key end

     0   :  { %12 = vsyncpa [#allocation4], 0  ;;  %s810_s0 = inlined_call_operand.hbm [shape: f32[8,384], index: 0, kind: input, shape index: {}]   ;;  %s811_s1 = inlined_call_operand.hbm [shape: f32[1,128], index: 1, kind: input, shape index: {}]   ;;  %s812_s2 = inlined_call_operand.hbm [shape: f32[128,384], index: 2, kind: input, shape index: {}]   ;;  %s813_s3 = inlined_call_operand.hbm [shape: f32[128,384], index: 3, kind: input, shape index: {}]   ;;  %s814_s4 = inlined_call_operand.hbm [shape: f32[2,384], index: 4, kind: input, shape index: {}]   ;;  %s815_s5 = inlined_call_operand.hbm [shape: f32[8,128], index: 5, kind: output, shape index: {0}]   ;;  %s816_s6 = inlined_call_operand.hbm [shape: f32[1,128], index: 6, kind: output, shape index: {1}]  }
   0x1   :  { %13 = vsyncpa [#allocation7], 0 }
   0x2   :  { %14 = vsyncpa [#allocation10], 0 }
   0x3   :  { %15 = vsyncpa [#allocation5], 0  ;;  %s33_s23 = sshll.u32 %s811_s1, 4  ;;  %s34_s23 = int_to_ptr.hbm [resolvable:$true] %s33_s23 }
   0x4   :  { %16 = vsyncpa [#allocation14], 0  ;;  %s574_s24 = smov [#allocation6]   ;;  %s56_s28 = sshll.u32 %s813_s3, 4  ;;  %s57_s28 = int_to_ptr.hbm [resolvable:$true] %s56_s28 }
   0x5   :  { %s35_s25 = sshll.u32 %s574_s24, 4  ;;  %s575_s29 = smov [#allocation9]   ;;  %s36_s25 = int_to_ptr.vmem [resolvable:$true] %s35_s25 }
   0x6   :  { %38 = dma.hbm_to_vmem [thread:$0]  %s34_s23, 16, %s36_s25, [#allocation7]  }
   0x7   :  { %s58_s30 = sshll.u32 %s575_s29, 4  ;;  %s22_s9 = sshll.u32 %s810_s0, 4  ;;  %s59_s30 = int_to_ptr.vmem [resolvable:$true] %s58_s30  ;;  %s23_s9 = int_to_ptr.hbm [resolvable:$true] %s22_s9 }
   0x8   :  { %s576_s1 = smov 384   ;;  %s577_s10 = smov 24  }
   0x9   :  { %64 = dma.hbm_to_vmem [thread:$0]  %s57_s28, 6144, %s59_s30, [#allocation10], %s576_s1, %s576_s1, %s577_s10  }
   0xa   :  { %s43_s13 = sshll.u32 %s812_s2, 4  ;;  %s578_s14 = smov [#allocation3]   ;;  %s44_s13 = int_to_ptr.hbm [resolvable:$true] %s43_s13 }
   0xb   :  { %s24_s15 = sshll.u32 %s578_s14, 4  ;;  %s579_s3 = smov [#allocation8]   ;;  %s25_s15 = int_to_ptr.vmem [resolvable:$true] %s24_s15 }
   0xc   :  { %27 = dma.hbm_to_vmem [thread:$0]  %s23_s9, 384, %s25_s15, [#allocation4]  }
   0xd   :  { %s45_s16 = sshll.u32 %s579_s3, 4  ;;  %s70_s0 = sshll.u32 %s814_s4, 4  ;;  %s46_s16 = int_to_ptr.vmem [resolvable:$true] %s45_s16  ;;  %s71_s0 = int_to_ptr.hbm [resolvable:$true] %s70_s0 }
   0xe   :  { %51 = dma.hbm_to_vmem [thread:$0]  %s44_s13, 6144, %s46_s16, [#allocation7], %s576_s1, %s576_s1, %s577_s10  }
   0xf   :  { %s580_s19 = smov [#allocation11]  }
  0x10   :  { %s72_s20 = sshll.u32 %s580_s19, 4  ;;  %s73_s20 = int_to_ptr.vmem [resolvable:$true] %s72_s20 }
  0x11   :  { %75 = dma.hbm_to_vmem [thread:$0]  %s71_s0, 96, %s73_s20, [#allocation10]  }
  0x12   :  { %556 = dma.done.wait [#allocation4], 384  }
  0x13   :  { %557 = vsyncadd [#allocation4], 4294966912 }
  0x14   :  { %558 = dma.done.wait [#allocation7], 6160  }
  0x15   :  { %559 = vsyncadd [#allocation7], 4294961136 }
  0x16   :  { %560 = dma.done.wait [#allocation10], 6240  }
  0x17   :  { %561 = vsyncadd [#allocation10], 4294961056  ;;  %v633_v0 = vld [vmem:[#allocation8] sm:$0xff]  ;;  %v635_v1 = vld [vmem:[#allocation8 + $0x8] sm:$0xff]  ;;  %s733_s2 = smov 0  }
  0x18   :  { %817 = vst [vmem:[#allocation20_spill] sm:$0xff] %v633_v0  ;;  %v637_v2 = vld [vmem:[#allocation8 + $0x10] sm:$0xff]  ;;  %v639_v3 = vld [vmem:[#allocation8 + $0x18] sm:$0xff]  ;;  %v641_v4 = vld [vmem:[#allocation8 + $0x20] sm:$0xff] }
  0x19   :  { %818 = vst [vmem:[#allocation21_spill] sm:$0xff] %v635_v1  ;;  %v643_v5 = vld [vmem:[#allocation8 + $0x28] sm:$0xff]  ;;  %v645_v6 = vld [vmem:[#allocation8 + $0x30] sm:$0xff]  ;;  %v647_v7 = vld [vmem:[#allocation8 + $0x38] sm:$0xff] }
  0x1a   :  { %819 = vst [vmem:[#allocation22_spill] sm:$0xff] %v637_v2  ;;  %v649_v8 = vld [vmem:[#allocation8 + $0x40] sm:$0xff]  ;;  %v651_v9 = vld [vmem:[#allocation8 + $0x48] sm:$0xff]  ;;  %v653_v10 = vld [vmem:[#allocation8 + $0x50] sm:$0xff] }
  0x1b   :  { %820 = vst [vmem:[#allocation23_spill] sm:$0xff] %v639_v3  ;;  %v655_v11 = vld [vmem:[#allocation8 + $0x58] sm:$0xff]  ;;  %v657_v12 = vld [vmem:[#allocation8 + $0x60] sm:$0xff]  ;;  %v659_v13 = vld [vmem:[#allocation8 + $0x68] sm:$0xff] }
  0x1c   :  { %821 = vst [vmem:[#allocation24_spill] sm:$0xff] %v641_v4  ;;  %v661_v14 = vld [vmem:[#allocation8 + $0x70] sm:$0xff]  ;;  %v663_v15 = vld [vmem:[#allocation8 + $0x78] sm:$0xff]  ;;  %v665_v16 = vld [vmem:[#allocation8 + $0x80] sm:$0xff] }
  0x1d   :  { %822 = vst [vmem:[#allocation25_spill] sm:$0xff] %v643_v5  ;;  %v667_v17 = vld [vmem:[#allocation8 + $0x88] sm:$0xff]  ;;  %v669_v18 = vld [vmem:[#allocation8 + $0x90] sm:$0xff]  ;;  %v671_v19 = vld [vmem:[#allocation8 + $0x98] sm:$0xff] }
  0x1e   :  { %823 = vst [vmem:[#allocation26_spill] sm:$0xff] %v645_v6  ;;  %v673_v20 = vld [vmem:[#allocation8 + $0xa0] sm:$0xff]  ;;  %v675_v21 = vld [vmem:[#allocation8 + $0xa8] sm:$0xff]  ;;  %v677_v22 = vld [vmem:[#allocation8 + $0xb0] sm:$0xff] }
  0x1f   :  { %824 = vst [vmem:[#allocation27_spill] sm:$0xff] %v647_v7  ;;  %v679_v23 = vld [vmem:[#allocation8 + $0xb8] sm:$0xff]  ;;  %v681_v24 = vld [vmem:[#allocation8 + $0xc0] sm:$0xff]  ;;  %v683_v25 = vld [vmem:[#allocation8 + $0xc8] sm:$0xff] }
  0x20   :  { %825 = vst [vmem:[#allocation28_spill] sm:$0xff] %v649_v8  ;;  %v685_v26 = vld [vmem:[#allocation8 + $0xd0] sm:$0xff]  ;;  %v687_v27 = vld [vmem:[#allocation8 + $0xd8] sm:$0xff]  ;;  %v689_v28 = vld [vmem:[#allocation8 + $0xe0] sm:$0xff] }
  0x21   :  { %826 = vst [vmem:[#allocation29_spill] sm:$0xff] %v651_v9  ;;  %v691_v29 = vld [vmem:[#allocation8 + $0xe8] sm:$0xff]  ;;  %v693_v30 = vld [vmem:[#allocation8 + $0xf0] sm:$0xff]  ;;  %v695_v31 = vld [vmem:[#allocation8 + $0xf8] sm:$0xff] }
  0x22   :  { %v697_v32 = vld [vmem:[#allocation8 + $0x100] sm:$0xff]  ;;  %v699_v33 = vld [vmem:[#allocation8 + $0x108] sm:$0xff]  ;;  %v701_v34 = vld [vmem:[#allocation8 + $0x110] sm:$0xff] }
  0x23   :  { %v703_v35 = vld [vmem:[#allocation8 + $0x118] sm:$0xff]  ;;  %v705_v36 = vld [vmem:[#allocation8 + $0x120] sm:$0xff]  ;;  %v707_v37 = vld [vmem:[#allocation8 + $0x128] sm:$0xff] }
  0x24   :  { %v709_v38 = vld [vmem:[#allocation8 + $0x130] sm:$0xff]  ;;  %v711_v39 = vld [vmem:[#allocation8 + $0x138] sm:$0xff]  ;;  %v713_v40 = vld [vmem:[#allocation8 + $0x140] sm:$0xff] }
  0x25   :  { %v715_v41 = vld [vmem:[#allocation8 + $0x148] sm:$0xff]  ;;  %v717_v42 = vld [vmem:[#allocation8 + $0x150] sm:$0xff]  ;;  %v719_v43 = vld [vmem:[#allocation8 + $0x158] sm:$0xff] }
  0x26   :  { %v721_v44 = vld [vmem:[#allocation8 + $0x160] sm:$0xff]  ;;  %v723_v45 = vld [vmem:[#allocation8 + $0x168] sm:$0xff]  ;;  %v725_v46 = vld [vmem:[#allocation8 + $0x170] sm:$0xff] }
  0x27   :  { %v727_v47 = vld [vmem:[#allocation8 + $0x178] sm:$0xff]  ;;  %v729_v48 = vld [vmem:[#allocation11 + $0x1] ss:$2 sm:$0x7] }
  0x28   :  { %v100_v49 = vld [vmem:[#allocation6] sm:$0x1] }
  0x29   :  { %101 = vst [vmem:[#allocation2] sm:$0x1] %v100_v49 }
  0x30   :  { %v152_v50 = vld [vmem:[#allocation2] sm:$0x1]  }
  0x31 LB: > { %176 = vmatpush.msra.mxu0 %v723_v45  ;;  %196 = vmatpush.msra.mxu1 %v725_v46  ;;  %v827_v9 = vld [vmem:[#allocation29_spill] sm:$0xff]  ;;  %v828_v6 = vld [vmem:[#allocation26_spill] sm:$0xff]  ;;  %v829_v7 = vld [vmem:[#allocation27_spill] sm:$0xff]  ;;  %s160_s4 = sshra.s32 %s572_s2, 3  ;;  %s163_s22 = sand.u32 7, %s572_s2  ;;  %v170_v52 = vperm.slane %v729_v48, 0  ;;  %s572_s2 = sphi %s733_s2, %s158_s2   ;;  %v568_v50 = vphi %v152_v50, %v837_v50  }
  0x32   : > { %216 = vmatpush.msra.mxu2 %v727_v47  ;;  %v830_v8 = vld [vmem:[#allocation28_spill] sm:$0xff]  ;;  %v831_v3 = vld [vmem:[#allocation23_spill] sm:$0xff]  ;;  %v833_v5 = vld [vmem:[#allocation25_spill] sm:$0xff]  ;;  %s342_s21 = smul.u32 24, %s160_s4  ;;  %v171_v53 = vperm.slane %v729_v48, 1  ;;  %s288_s25 = scalar_lea.vmem [#allocation12], %s572_s2 }
  0x33   : > { %177 = vmatpush.msra.mxu0 %v717_v42  ;;  %197 = vmatpush.msra.mxu1 %v719_v43  ;;  %v832_v4 = vld [vmem:[#allocation24_spill] sm:$0xff]  ;;  %v835_v1 = vld [vmem:[#allocation21_spill] sm:$0xff]  ;;  %v836_v2 = vld [vmem:[#allocation22_spill] sm:$0xff]  ;;  %s158_s2 = sadd.s32 1, %s572_s2  }
  0x34   : > { %217 = vmatpush.msra.mxu2 %v721_v44  ;;  %v834_v0 = vld [vmem:[#allocation20_spill] sm:$0xff]  ;;  %s166_s23 = sadd.s32 %s342_s21, %s163_s22  ;;  %p155_p0 = scmp.ge.s32.totalorder %s158_s2, 8  }
  0x35   : > { %178 = vmatpush.msra.mxu0 %v711_v39  ;;  %198 = vmatpush.msra.mxu1 %v713_v40  ;;  %s167_s24 = scalar_lea.vmem [#allocation3], %s166_s23  ;;  %s302_s28 = sshll.u32 (%p155_p0), %s815_s5, 4  ;;  %s303_s28 = int_to_ptr.hbm [resolvable:$true] %s302_s28 }
  0x36   : > { %218 = vmatpush.msra.mxu2 %v715_v41  ;;  %v168_v51 = vld [vmem:[%s167_s24] ss:$8 sm:$0x7]  ;;  %s581_s29 = smov (%p155_p0), [#allocation12]   ;;  %s582_s7 = smov (%p155_p0), [#allocation13]  }
  0x37   : > { %179 = vmatpush.msra.mxu0 %v705_v36  ;;  %199 = vmatpush.msra.mxu1 %v707_v37  ;;  %v257_v54 = vrot.slane %v168_v51, 1  ;;  %s300_s30 = sshll.u32 (%p155_p0), %s581_s29, 4  ;;  %s311_s8 = sshll.u32 (%p155_p0), %s582_s7, 4  ;;  %s301_s30 = int_to_ptr.vmem [resolvable:$true] %s300_s30  ;;  %s312_s8 = int_to_ptr.vmem [resolvable:$true] %s311_s8 }
  0x38   : > { %219 = vmatpush.msra.mxu2 %v709_v38  ;;  %s313_s10 = sshll.u32 (%p155_p0), %s816_s6, 4  ;;  %s314_s10 = int_to_ptr.hbm [resolvable:$true] %s313_s10 }
  0x39   : > { %180 = vmatpush.msra.mxu0 %v699_v33  ;;  %200 = vmatpush.msra.mxu1 %v701_v34 }
  0x3a   : > { %220 = vmatpush.msra.mxu2 %v703_v35 }
  0x3b   : > { %181 = vmatpush.msra.mxu0 %v693_v30  ;;  %201 = vmatpush.msra.mxu1 %v695_v31 }
  0x3c   : > { %221 = vmatpush.msra.mxu2 %v697_v32 }
  0x3d   : > { %182 = vmatpush.msra.mxu0 %v687_v27  ;;  %202 = vmatpush.msra.mxu1 %v689_v28 }
  0x3e   : > { %222 = vmatpush.msra.mxu2 %v691_v29 }
  0x3f   : > { %183 = vmatpush.msra.mxu0 %v681_v24  ;;  %203 = vmatpush.msra.mxu1 %v683_v25 }
  0x40   : > { %223 = vmatpush.msra.mxu2 %v685_v26 }
  0x41   : > { %184 = vmatpush.msra.mxu0 %v675_v21  ;;  %204 = vmatpush.msra.mxu1 %v677_v22 }
  0x42   : > { %224 = vmatpush.msra.mxu2 %v679_v23 }
  0x43   : > { %185 = vmatpush.msra.mxu0 %v669_v18  ;;  %205 = vmatpush.msra.mxu1 %v671_v19 }
  0x44   : > { %225 = vmatpush.msra.mxu2 %v673_v20 }
  0x45   : > { %186 = vmatpush.msra.mxu0 %v663_v15  ;;  %206 = vmatpush.msra.mxu1 %v665_v16 }
  0x46   : > { %226 = vmatpush.msra.mxu2 %v667_v17 }
  0x47   : > { %187 = vmatpush.msra.mxu0 %v657_v12  ;;  %207 = vmatpush.msra.mxu1 %v659_v13 }
  0x48   : > { %227 = vmatpush.msra.mxu2 %v661_v14 }
  0x49   : > { %188 = vmatpush.msra.mxu0 %v827_v9  ;;  %208 = vmatpush.msra.mxu1 %v653_v10 }
  0x4a   : > { %228 = vmatpush.msra.mxu2 %v655_v11 }
  0x4b   : > { %189 = vmatpush.msra.mxu0 %v828_v6  ;;  %209 = vmatpush.msra.mxu1 %v829_v7  ;;  %v172_v6 = vperm.slane %v729_v48, 2 }
  0x4c   : > { %229 = vmatpush.msra.mxu2 %v830_v8 }
  0x4d   : > { %190 = vmatpush.msra.mxu0 %v831_v3  ;;  %210 = vmatpush.msra.mxu1 %v832_v4 }
  0x4e   : > { %230 = vmatpush.msra.mxu2 %v833_v5 }
  0x4f   : > { %191 = vmatpush.msra.mxu0 %v834_v0  ;;  %211 = vmatpush.msra.mxu1 %v835_v1 }
  0x50   : > { %192 = vmatmul.f32.vlgmr.msra.gmra.mxu0 %v568_v50  ;;  %212 = vmatmul.f32.vlgmr.msra.gmra.mxu1 %v568_v50 }
  0x51   : > { %231 = vmatpush.msra.mxu2 %v836_v2 }
  0x52   : > { %232 = vmatmul.f32.vlgmr.msra.gmra.mxu2 %v568_v50 }
  0xcd   : > { %v193_v55 = vpop.f32.mrf.mxu0  ;;  %v213_v56 = vpop.f32.mrf.mxu1 }
  0xce   : > { %v194_v57 = vadd.f32 %v193_v55, %v170_v52  ;;  %v214_v58 = vadd.f32 %v213_v56, %v171_v53 }
  0xd0   : > { %v236_v59 = vadd.f32 %v194_v57, %v168_v51  ;;  %v259_v60 = vadd.f32 %v257_v54, %v214_v58 }
  0xd2   : > { %v343_v61 = vmul.f32 -1.442695, %v236_v59  ;;  %v344_v62 = vmul.f32 -1.442695, %v259_v60 }
  0xd4   : > { %370 = vpow2.f32 %v343_v61 }
  0xd5   : > { %372 = vpow2.f32 %v344_v62  ;;  %v233_v55 = vpop.f32.mrf.mxu2 }
  0xd6   : > { %v234_v59 = vadd.f32 %v233_v55, %v172_v6 }
  0xda   : > { %v371_v63 = vpop.eup %370 }
  0xdb   : > { %v373_v49 = vpop.eup %372  ;;  %v240_v0 = vadd.f32 1.0, %v371_v63  ;;  %v280_v63 = vrot.slane %v168_v51, 2 }
  0xdc   : > { %v263_v1 = vadd.f32 1.0, %v373_v49 }
  0xdd   : > { %374 = vrcp.f32 %v240_v0  ;;  %v252_v54 = vand.u32 2147483648, %v240_v0  ;;  %v250_v57 = vand.u32 2147483647, %v240_v0  ;;  %vm246_vm1 = vweird.f32 %v240_v0 }
  0xde   : > { %376 = vrcp.f32 %v263_v1  ;;  %vm269_vm4 = vweird.f32 %v263_v1  ;;  %v273_v8 = vand.u32 2147483647, %v263_v1 }
  0xdf   : > { %v253_v61 = vor.u32 1.1754944e-38, %v252_v54  ;;  %vm251_vm3 = vcmp.eq.f32.partialorder %v250_v57, 8.507059e+37 }
  0xe0   : > { %vm274_vm7 = vcmp.eq.f32.partialorder %v273_v8, 8.507059e+37 }
  0xe3   : > { %v375_v2 = vpop.eup %374 }
  0xe4   : > { %v377_v3 = vpop.eup %376  ;;  %v242_v4 = vmul.f32 %v375_v2, %v240_v0  ;;  %vm247_vm0 = vweird.f32 %v375_v2 }
  0xe5   : > { %v265_v5 = vmul.f32 %v377_v3, %v263_v1  ;;  %vm248_vm2 = vmor %vm246_vm1, %vm247_vm0  ;;  %vm270_vm5 = vweird.f32 %v377_v3 }
  0xe6   : > { %v243_v52 = vsub.f32 1.0, %v242_v4  ;;  %v275_v4 = vand.u32 2147483648, %v263_v1  ;;  %vm271_vm6 = vmor %vm269_vm4, %vm270_vm5 }
  0xe7   : > { %v266_v53 = vsub.f32 1.0, %v265_v5 }
  0xe8   : > { %v244_v56 = vmul.f32 %v375_v2, %v243_v52 }
  0xe9   : > { %v267_v58 = vmul.f32 %v377_v3, %v266_v53  ;;  %v276_v53 = vor.u32 1.1754944e-38, %v275_v4 }
  0xea   : > { %v245_v60 = vadd.f32 %v375_v2, %v244_v56 }
  0xeb   : > { %v268_v7 = vadd.f32 %v377_v3, %v267_v58 }
  0xec   : > { %v249_v62 = vsel %vm248_vm2, %v375_v2, %v245_v60 }
  0xed   : > { %v254_v49 = vsel %vm251_vm3, %v253_v61, %v249_v62  ;;  %v272_v9 = vsel %vm271_vm6, %v377_v3, %v268_v7 }
  0xee   : > { %v279_v5 = vmul.f32 %v254_v49, %v234_v59  ;;  %v277_v0 = vsel %vm274_vm7, %v276_v53, %v272_v9 }
  0xef   : > { %v284_v6 = vsub.f32 1.0, %v277_v0  ;;  %v286_v51 = vmul.f32 %v568_v50, %v277_v0 }
  0xf0   : > { %v282_v52 = vadd.f32 %v280_v63, %v279_v5 }
  0xf2   : > { %378 = vtanh.f32 %v282_v52 }
  0xf8   : > { %v379_v55 = vpop.eup %378 }
  0xf9   : > { %v285_v2 = vmul.f32 %v379_v55, %v284_v6  ;;  %157 = sbr.rel (!%p155_p0) target bundleno = 49 (0x31), region = 86 }
  0xfb   : > { %v287_v54 = vadd.f32 %v286_v51, %v285_v2  }
  0xfd   : > { %289 = vst [vmem:[%s288_s25] sm:$0x1] %v287_v54  ;;  %v837_v50 = vmov %v287_v54 }
  0xfe   :  { %294 = vst [vmem:[#allocation13] sm:$0x1] %v287_v54  ;;  %305 = dma.vmem_to_hbm [thread:$0]  %s301_s30, 128, %s303_s28, [#allocation5]  }
  0xff   :  { %290 = vst [vmem:[#allocation2] sm:$0x1] %v287_v54  ;;  %316 = dma.vmem_to_hbm [thread:$0]  %s312_s8, 16, %s314_s10, [#allocation14]  }
 0x100   :  { %562 = dma.done.wait [#allocation5], 128  }
 0x101   :  { %563 = vsyncadd [#allocation5], 4294967168 }
 0x102   :  { %564 = dma.done.wait [#allocation14], 16  }
 0x103   :  { %565 = vsyncadd [#allocation14], 4294967280 }
 0x104   :  { %325 = vsyncpa [#allocation4], 1 }
 0x105   :  { %326 = vsyncpa [#allocation7], 1 }
 0x106   :  { %327 = vsyncpa [#allocation10], 1 }
 0x107   :  { %328 = vsyncpa [#allocation5], 1 }
 0x108   :  { %329 = vsyncpa [#allocation14], 1 }

</bundles_post_ra>
